<compile_context>
chip_gen: v7x
topology: tpu7x:2x2x1
jax: 0.10.0
libtpu: 0.0.40
codegen_flags: <defaults>
</compile_context>

<pallas_src>
import jax
import jax.numpy as jnp
from jax.experimental import pallas as pl
from jax.experimental.pallas import tpu as pltpu


# ---------------------------------------------------------------------------
# Fused Pallas kernel: TB batch elements per grid step
# ---------------------------------------------------------------------------
def _deepmil_kernel(x_ref, w_a1_ref, b_a1_ref, w_a2_ref, b_a2_ref,
                    w_c1_ref, b_c1_ref, w_c2t_ref, b_c2_ref,
                    attn_ref, out_ref):
    TB, K, D = x_ref.shape
    dim = w_a1_ref.shape[1]
    C = w_c2t_ref.shape[0]

    x = x_ref[...]                                   # (TB, K, D)
    x2d = x.reshape(TB * K, D)

    # ---- attention MLP: Linear(D,dim) -> tanh -> Linear(dim,1) ----
    # One (TB*K, D) @ (D, dim) matmul — fills the MXU M dimension.
    h = jnp.tanh(
        jnp.dot(x2d, w_a1_ref[...], preferred_element_type=jnp.float32)
        + b_a1_ref[...])                             # (TB*K, dim) f32
    # Second linear has out_features == 1: VPU multiply + lane reduce
    # (avoids an N=1 MXU push).  K stays on the lane axis of the result.
    scores = jnp.sum(h.reshape(TB, K, dim) * w_a2_ref[...], axis=2)   # (TB, K)
    scores = scores + b_a2_ref[0]                    # scalar bias from SMEM

    # ---- masked_fill((x == 0).all(dim=-1), -9e15) ----
    all_zero = jnp.max(jnp.abs(x), axis=2) == 0.0    # (TB, K) bool
    scores = jnp.where(all_zero, jnp.float32(-9e15), scores)

    # ---- softmax over the patch axis K (lane reduction) ----
    m = jnp.max(scores, axis=1, keepdims=True)
    e = jnp.exp(scores - m)
    a = e / jnp.sum(e, axis=1, keepdims=True)        # (TB, K) f32
    attn_ref[...] = a.astype(attn_ref.dtype)

    # ---- attention-weighted pooling as an MXU batched contraction ----
    pooled = jnp.einsum(
        "bqk,bkd->bqd", a.astype(x.dtype).reshape(TB, 1, K), x,
        preferred_element_type=jnp.float32).reshape(TB, D)   # (TB, D) f32

    # ---- classifier: Linear(D,dim) -> ReLU -> Linear(dim,C) ----
    h2 = jnp.maximum(
        jnp.dot(pooled.astype(w_c1_ref.dtype), w_c1_ref[...],
                preferred_element_type=jnp.float32)
        + b_c1_ref[...], 0.0)                        # (TB, dim) f32
    # num_classes is tiny: per-class VPU multiply + lane reduce keeps the
    # MXU free instead of an N=C push.
    w_c2t = w_c2t_ref[...]                           # (C, dim)
    cols = [jnp.sum(h2 * w_c2t[c][None, :], axis=1, keepdims=True)
            for c in range(C)]
    logits = jnp.concatenate(cols, axis=1) + b_c2_ref[...]    # (TB, C)
    out_ref[...] = logits.astype(out_ref.dtype)


# ---------------------------------------------------------------------------
# Wrapper
# ---------------------------------------------------------------------------
def deepmil_forward(x, params, *, block_b=None, compute_dtype=jnp.float32):
    """x: (B, K, D) float32.  Returns (A: (B, K, 1), out: (B, C))."""
    B, K, D = x.shape
    dim = params["w_a1"].shape[1]
    C = params["w_c2"].shape[1]

    # ---- batch-block size: aim TB*K ~ 256 rows (v6e/v7x MXU; 128 already
    # saturates v5e).  Halve for v7x if K*D grows so 2x double-buffered x
    # blocks stay well inside its 64 MiB VMEM. ----
    if block_b is None:
        block_b = max(1, 256 // max(K, 1))
    if block_b >= B:
        block_b = B                                   # full batch, one step
    else:
        block_b = max(8, (block_b // 8) * 8)          # sublane-aligned blocks
    nb = pl.cdiv(B, block_b)
    Bp = nb * block_b

    xp = x if Bp == B else jnp.pad(x, ((0, Bp - B), (0, 0), (0, 0)))
    # bf16 MXU inputs are opt-in (v6e/v7x); elementwise / softmax math stays f32.
    xp = xp.astype(compute_dtype)
    w_a1 = params["w_a1"].astype(compute_dtype)                 # (D, dim)
    w_c1 = params["w_c1"].astype(compute_dtype)                 # (D, dim)
    b_a1 = params["b_a1"].reshape(1, dim).astype(jnp.float32)
    w_a2 = params["w_a2"].reshape(1, dim).astype(jnp.float32)   # lane-dense row
    b_a2 = params["b_a2"].reshape(1).astype(jnp.float32)        # SMEM scalar
    b_c1 = params["b_c1"].reshape(1, dim).astype(jnp.float32)
    w_c2t = params["w_c2"].T.astype(jnp.float32)                # (C, dim)
    b_c2 = params["b_c2"].reshape(1, C).astype(jnp.float32)

    const2 = lambda b: (0, 0)

    attn, logits = pl.pallas_call(
        _deepmil_kernel,
        out_shape=(
            jax.ShapeDtypeStruct((Bp, K), jnp.float32),   # A, K on the lane axis
            jax.ShapeDtypeStruct((Bp, C), jnp.float32),   # logits
        ),
        grid=(nb,),
        in_specs=[
            pl.BlockSpec((block_b, K, D), lambda b: (b, 0, 0)),
            pl.BlockSpec((D, dim), const2),
            pl.BlockSpec((1, dim), const2),
            pl.BlockSpec((1, dim), const2),
            pl.BlockSpec(memory_space=pltpu.MemorySpace.SMEM),  # b_a2 scalar
            pl.BlockSpec((D, dim), const2),
            pl.BlockSpec((1, dim), const2),
            pl.BlockSpec((C, dim), const2),
            pl.BlockSpec((1, C), const2),
        ],
        out_specs=(
            pl.BlockSpec((block_b, K), lambda b: (b, 0)),
            pl.BlockSpec((block_b, C), lambda b: (b, 0)),
        ),
        compiler_params=pltpu.CompilerParams(
            dimension_semantics=("parallel",),
        ),
    )(xp, w_a1, b_a1, w_a2, b_a2, w_c1, b_c1, w_c2t, b_c2)

    return attn[:B].reshape(B, K, 1), logits[:B]


# ---------------------------------------------------------------------------
# Plain-JAX reference (mirrors the PyTorch forward) + params
# ---------------------------------------------------------------------------
def deepmil_reference(x, params):
    h = jnp.tanh(jnp.einsum("bkd,dh->bkh", x, params["w_a1"]) + params["b_a1"])
    scores = jnp.einsum("bkh,h->bk", h, params["w_a2"])[..., None] + params["b_a2"]
    all_zero = jnp.all(x == 0.0, axis=2, keepdims=True)
    scores = jnp.where(all_zero, -9e15, scores)
    A = jax.nn.softmax(scores, axis=1)                          # (B, K, 1)
    M = jnp.sum(A * x, axis=1)                                  # (B, D)
    h2 = jnp.maximum(M @ params["w_c1"] + params["b_c1"], 0.0)
    out = h2 @ params["w_c2"] + params["b_c2"]
    return A, out


def init_params(key, d, dim, num_classes):
    ks = jax.random.split(key, 8)
    s = 0.1
    return {
        "w_a1": s * jax.random.normal(ks[0], (d, dim), jnp.float32),
        "b_a1": s * jax.random.normal(ks[1], (dim,), jnp.float32),
        "w_a2": s * jax.random.normal(ks[2], (dim,), jnp.float32),
        "b_a2": s * jax.random.normal(ks[3], (), jnp.float32),
        "w_c1": s * jax.random.normal(ks[4], (d, dim), jnp.float32),
        "b_c1": s * jax.random.normal(ks[5], (dim,), jnp.float32),
        "w_c2": s * jax.random.normal(ks[6], (dim, num_classes), jnp.float32),
        "b_c2": s * jax.random.normal(ks[7], (num_classes,), jnp.float32),
    }


if __name__ == "__main__":
    # cfg = {'backbone': 'alexnet', 'num_classes': 2}  ->  out_channel = 256
    D, DIM, C = 256, 128, 2
    B, K = 2, 8                                    # batch x nb_patch

    key = jax.random.PRNGKey(0)
    kx, kp = jax.random.split(key)
    x = jax.random.normal(kx, (B, K, D), jnp.float32)
    x = x.at[0, 2, :].set(0.0)                     # exercise the masked_fill path
    params = init_params(kp, D, DIM, C)

    attn, out = deepmil_forward(x, params)
    attn, out = jax.block_until_ready((attn, out))

    assert attn.shape == (B, K, 1), attn.shape
    assert out.shape == (B, C), out.shape

    a_ref, o_ref = deepmil_reference(x, params)
    assert jnp.allclose(attn, a_ref, rtol=1e-3, atol=1e-3)
    assert jnp.allclose(out, o_ref, rtol=1e-3, atol=1e-3)

    # Larger batch: exercises the multi-step grid (TB < B) and the
    # zero-padded tail-batch path.
    B2 = 40
    kx2, _ = jax.random.split(kx)
    x2 = jax.random.normal(kx2, (B2, K, D), jnp.float32)
    x2 = x2.at[5, 0, :].set(0.0)
    attn2, out2 = jax.block_until_ready(deepmil_forward(x2, params))
    a2_ref, o2_ref = deepmil_reference(x2, params)
    assert attn2.shape == (B2, K, 1) and out2.shape == (B2, C)
    assert jnp.allclose(attn2, a2_ref, rtol=1e-3, atol=1e-3)
    assert jnp.allclose(out2, o2_ref, rtol=1e-3, atol=1e-3)

    print("KERNEL_OK")
</pallas_src>

<mosaic_0001>
module attributes {stable_mosaic.version = 11 : i64} {
  func.func @_deepmil_kernel(%arg0: i32, %arg1: memref<2x8x256xf32, #tpu.memory_space<vmem>>, %arg2: memref<256x128xf32, #tpu.memory_space<vmem>>, %arg3: memref<1x128xf32, #tpu.memory_space<vmem>>, %arg4: memref<1x128xf32, #tpu.memory_space<vmem>>, %arg5: memref<1xf32, #tpu.memory_space<smem>>, %arg6: memref<256x128xf32, #tpu.memory_space<vmem>>, %arg7: memref<1x128xf32, #tpu.memory_space<vmem>>, %arg8: memref<2x128xf32, #tpu.memory_space<vmem>>, %arg9: memref<1x2xf32, #tpu.memory_space<vmem>>, %arg10: memref<2x8xf32, #tpu.memory_space<vmem>>, %arg11: memref<2x2xf32, #tpu.memory_space<vmem>>) attributes {dimension_semantics = [#tpu.dimension_semantics<parallel>], iteration_bounds = array<i64: 1>, scalar_prefetch = 0 : i64, scratch_operands = 0 : i64, tpu.core_type = #tpu.core_type<tc>, window_params = [{transform_indices = @transform_0, window_bounds = array<i64: 2, 8, 256>}, {pipeline_mode = #tpu.pipeline_mode<synchronous>, transform_indices = @transform_1, window_bounds = array<i64: 256, 128>}, {pipeline_mode = #tpu.pipeline_mode<synchronous>, transform_indices = @transform_2, window_bounds = array<i64: 1, 128>}, {pipeline_mode = #tpu.pipeline_mode<synchronous>, transform_indices = @transform_3, window_bounds = array<i64: 1, 128>}, {transform_indices = @transform_4, window_bounds = array<i64: 1>}, {pipeline_mode = #tpu.pipeline_mode<synchronous>, transform_indices = @transform_5, window_bounds = array<i64: 256, 128>}, {pipeline_mode = #tpu.pipeline_mode<synchronous>, transform_indices = @transform_6, window_bounds = array<i64: 1, 128>}, {pipeline_mode = #tpu.pipeline_mode<synchronous>, transform_indices = @transform_7, window_bounds = array<i64: 2, 128>}, {pipeline_mode = #tpu.pipeline_mode<synchronous>, transform_indices = @transform_8, window_bounds = array<i64: 1, 2>}, {transform_indices = @transform_9, window_bounds = array<i64: 2, 8>}, {transform_indices = @transform_10, window_bounds = array<i64: 2, 2>}]} {
    %c0 = arith.constant 0 : index
    %c0_0 = arith.constant 0 : index
    %c0_1 = arith.constant 0 : index
    %0 = vector.load %arg1[%c0, %c0_0, %c0_1] : memref<2x8x256xf32, #tpu.memory_space<vmem>>, vector<2x8x256xf32>
    %1 = vector.shape_cast %0 : vector<2x8x256xf32> to vector<16x256xf32>
    %c0_2 = arith.constant 0 : index
    %c0_3 = arith.constant 0 : index
    %2 = vector.load %arg2[%c0_2, %c0_3] : memref<256x128xf32, #tpu.memory_space<vmem>>, vector<256x128xf32>
    %cst = arith.constant dense<0.000000e+00> : vector<16x128xf32>
    %3 = tpu.matmul %1, %2, %cst {dimension_numbers = #tpu.dot_dimension_numbers<[1], [0], [0], [1], [0, 0, 1, 1], [], []>} : vector<16x256xf32>, vector<256x128xf32>, vector<16x128xf32> -> vector<16x128xf32>
    %c0_4 = arith.constant 0 : index
    %c0_5 = arith.constant 0 : index
    %4 = vector.load %arg3[%c0_4, %c0_5] : memref<1x128xf32, #tpu.memory_space<vmem>>, vector<1x128xf32>
    %5 = vector.broadcast %4 : vector<1x128xf32> to vector<16x128xf32>
    %6 = arith.addf %3, %5 : vector<16x128xf32>
    %7 = math.tanh %6 : vector<16x128xf32>
    %8 = vector.shape_cast %7 : vector<16x128xf32> to vector<2x8x128xf32>
    %c0_6 = arith.constant 0 : index
    %c0_7 = arith.constant 0 : index
    %9 = vector.load %arg4[%c0_6, %c0_7] : memref<1x128xf32, #tpu.memory_space<vmem>>, vector<1x128xf32>
    %10 = vector.shape_cast %9 : vector<1x128xf32> to vector<1x1x128xf32>
    %11 = vector.broadcast %10 : vector<1x1x128xf32> to vector<2x8x128xf32>
    %12 = arith.mulf %8, %11 : vector<2x8x128xf32>
    %cst_8 = arith.constant dense<0.000000e+00> : vector<2x8xf32>
    %13 = vector.multi_reduction <add>, %12, %cst_8 [2] : vector<2x8x128xf32> to vector<2x8xf32>
    %c0_9 = arith.constant 0 : index
    %14 = memref.load %arg5[%c0_9] : memref<1xf32, #tpu.memory_space<smem>>
    %15 = vector.broadcast %14 : f32 to vector<2x8xf32>
    %16 = arith.addf %13, %15 : vector<2x8xf32>
    %17 = math.absf %0 : vector<2x8x256xf32>
    %cst_10 = arith.constant dense<0xFF800000> : vector<2x8xf32>
    %18 = vector.multi_reduction <maximumf>, %17, %cst_10 [2] : vector<2x8x256xf32> to vector<2x8xf32>
    %cst_11 = arith.constant 0.000000e+00 : f32
    %19 = vector.broadcast %cst_11 : f32 to vector<2x8xf32>
    %20 = arith.cmpf oeq, %18, %19 : vector<2x8xf32>
    %cst_12 = arith.constant -9.000000e+15 : f32
    %21 = vector.broadcast %cst_12 : f32 to vector<2x8xf32>
    %22 = arith.select %20, %21, %16 : vector<2x8xi1>, vector<2x8xf32>
    %cst_13 = arith.constant dense<0xFF800000> : vector<2xf32>
    %23 = vector.multi_reduction <maximumf>, %22, %cst_13 [1] : vector<2x8xf32> to vector<2xf32>
    %24 = vector.shape_cast %23 : vector<2xf32> to vector<2x1xf32>
    %25 = vector.broadcast %24 : vector<2x1xf32> to vector<2x8xf32>
    %26 = arith.subf %22, %25 : vector<2x8xf32>
    %27 = math.exp %26 : vector<2x8xf32>
    %cst_14 = arith.constant dense<0.000000e+00> : vector<2xf32>
    %28 = vector.multi_reduction <add>, %27, %cst_14 [1] : vector<2x8xf32> to vector<2xf32>
    %29 = vector.shape_cast %28 : vector<2xf32> to vector<2x1xf32>
    %30 = vector.broadcast %29 : vector<2x1xf32> to vector<2x8xf32>
    %31 = arith.divf %27, %30 : vector<2x8xf32>
    %c0_15 = arith.constant 0 : index
    %c0_16 = arith.constant 0 : index
    %32 = vector.load %arg10[%c0_15, %c0_16] : memref<2x8xf32, #tpu.memory_space<vmem>>, vector<2x8xf32>
    tpu.vector_store %arg10[%c0_15, %c0_16], %31 {strides = array<i32>} : memref<2x8xf32, #tpu.memory_space<vmem>>, vector<2x8xf32>,
    %33 = vector.shape_cast %31 : vector<2x8xf32> to vector<2x1x8xf32>
    "tpu.trace_start"() <{level = 10 : i32, message = "bqk,bkd->bqd"}> : () -> ()
    %cst_17 = arith.constant dense<0.000000e+00> : vector<2x1x256xf32>
    %34 = tpu.matmul %33, %0, %cst_17 {dimension_numbers = #tpu.dot_dimension_numbers<[2], [1], [1], [2], [0, 0, 0, 1, 1, 2], [0], [0]>} : vector<2x1x8xf32>, vector<2x8x256xf32>, vector<2x1x256xf32> -> vector<2x1x256xf32>
    "tpu.trace_stop"() : () -> ()
    %35 = vector.shape_cast %34 : vector<2x1x256xf32> to vector<2x256xf32>
    %c0_18 = arith.constant 0 : index
    %c0_19 = arith.constant 0 : index
    %36 = vector.load %arg6[%c0_18, %c0_19] : memref<256x128xf32, #tpu.memory_space<vmem>>, vector<256x128xf32>
    %cst_20 = arith.constant dense<0.000000e+00> : vector<2x128xf32>
    %37 = tpu.matmul %35, %36, %cst_20 {dimension_numbers = #tpu.dot_dimension_numbers<[1], [0], [0], [1], [0, 0, 1, 1], [], []>} : vector<2x256xf32>, vector<256x128xf32>, vector<2x128xf32> -> vector<2x128xf32>
    %c0_21 = arith.constant 0 : index
    %c0_22 = arith.constant 0 : index
    %38 = vector.load %arg7[%c0_21, %c0_22] : memref<1x128xf32, #tpu.memory_space<vmem>>, vector<1x128xf32>
    %39 = vector.broadcast %38 : vector<1x128xf32> to vector<2x128xf32>
    %40 = arith.addf %37, %39 : vector<2x128xf32>
    %cst_23 = arith.constant 0.000000e+00 : f32
    %41 = vector.broadcast %cst_23 : f32 to vector<2x128xf32>
    %42 = arith.maximumf %40, %41 : vector<2x128xf32>
    %c0_24 = arith.constant 0 : index
    %c0_25 = arith.constant 0 : index
    %43 = vector.load %arg8[%c0_24, %c0_25] : memref<2x128xf32, #tpu.memory_space<vmem>>, vector<2x128xf32>
    %44 = vector.extract_strided_slice %43 {offsets = [0, 0], sizes = [1, 128], strides = [1, 1]} : vector<2x128xf32> to vector<1x128xf32>
    %45 = vector.shape_cast %44 : vector<1x128xf32> to vector<128xf32>
    %46 = vector.shape_cast %45 : vector<128xf32> to vector<1x128xf32>
    %47 = vector.broadcast %46 : vector<1x128xf32> to vector<2x128xf32>
    %48 = arith.mulf %42, %47 : vector<2x128xf32>
    %cst_26 = arith.constant dense<0.000000e+00> : vector<2xf32>
    %49 = vector.multi_reduction <add>, %48, %cst_26 [1] : vector<2x128xf32> to vector<2xf32>
    %50 = vector.shape_cast %49 : vector<2xf32> to vector<2x1xf32>
    %51 = vector.extract_strided_slice %43 {offsets = [1, 0], sizes = [1, 128], strides = [1, 1]} : vector<2x128xf32> to vector<1x128xf32>
    %52 = vector.shape_cast %51 : vector<1x128xf32> to vector<128xf32>
    %53 = vector.shape_cast %52 : vector<128xf32> to vector<1x128xf32>
    %54 = vector.broadcast %53 : vector<1x128xf32> to vector<2x128xf32>
    %55 = arith.mulf %42, %54 : vector<2x128xf32>
    %cst_27 = arith.constant dense<0.000000e+00> : vector<2xf32>
    %56 = vector.multi_reduction <add>, %55, %cst_27 [1] : vector<2x128xf32> to vector<2xf32>
    %57 = vector.shape_cast %56 : vector<2xf32> to vector<2x1xf32>
    %58 = tpu.concatenate %50, %57 in 1 : vector<2x1xf32>, vector<2x1xf32> -> vector<2x2xf32>
    %c0_28 = arith.constant 0 : index
    %c0_29 = arith.constant 0 : index
    %59 = vector.load %arg9[%c0_28, %c0_29] : memref<1x2xf32, #tpu.memory_space<vmem>>, vector<1x2xf32>
    %60 = vector.broadcast %59 : vector<1x2xf32> to vector<2x2xf32>
    %61 = arith.addf %58, %60 : vector<2x2xf32>
    %c0_30 = arith.constant 0 : index
    %c0_31 = arith.constant 0 : index
    %62 = vector.load %arg11[%c0_30, %c0_31] : memref<2x2xf32, #tpu.memory_space<vmem>>, vector<2x2xf32>
    tpu.vector_store %arg11[%c0_30, %c0_31], %61 {strides = array<i32>} : memref<2x2xf32, #tpu.memory_space<vmem>>, vector<2x2xf32>,
    return
  }
  func.func @transform_0(%arg0: i32) -> (i32, i32, i32) {
    %c0_i32 = arith.constant 0 : i32
    %c0_i32_0 = arith.constant 0 : i32
    %c0_i32_1 = arith.constant 0 : i32
    return %arg0, %c0_i32, %c0_i32_0 : i32, i32, i32
  }
  func.func @transform_1(%arg0: i32) -> (i32, i32) {
    %c0_i32 = arith.constant 0 : i32
    %c0_i32_0 = arith.constant 0 : i32
    %c0_i32_1 = arith.constant 0 : i32
    return %c0_i32, %c0_i32_0 : i32, i32
  }
  func.func @transform_2(%arg0: i32) -> (i32, i32) {
    %c0_i32 = arith.constant 0 : i32
    %c0_i32_0 = arith.constant 0 : i32
    %c0_i32_1 = arith.constant 0 : i32
    return %c0_i32, %c0_i32_0 : i32, i32
  }
  func.func @transform_3(%arg0: i32) -> (i32, i32) {
    %c0_i32 = arith.constant 0 : i32
    %c0_i32_0 = arith.constant 0 : i32
    %c0_i32_1 = arith.constant 0 : i32
    return %c0_i32, %c0_i32_0 : i32, i32
  }
  func.func @transform_4(%arg0: i32) -> i32 {
    %c0_i32 = arith.constant 0 : i32
    %c0_i32_0 = arith.constant 0 : i32
    return %c0_i32 : i32
  }
  func.func @transform_5(%arg0: i32) -> (i32, i32) {
    %c0_i32 = arith.constant 0 : i32
    %c0_i32_0 = arith.constant 0 : i32
    %c0_i32_1 = arith.constant 0 : i32
    return %c0_i32, %c0_i32_0 : i32, i32
  }
  func.func @transform_6(%arg0: i32) -> (i32, i32) {
    %c0_i32 = arith.constant 0 : i32
    %c0_i32_0 = arith.constant 0 : i32
    %c0_i32_1 = arith.constant 0 : i32
    return %c0_i32, %c0_i32_0 : i32, i32
  }
  func.func @transform_7(%arg0: i32) -> (i32, i32) {
    %c0_i32 = arith.constant 0 : i32
    %c0_i32_0 = arith.constant 0 : i32
    %c0_i32_1 = arith.constant 0 : i32
    return %c0_i32, %c0_i32_0 : i32, i32
  }
  func.func @transform_8(%arg0: i32) -> (i32, i32) {
    %c0_i32 = arith.constant 0 : i32
    %c0_i32_0 = arith.constant 0 : i32
    %c0_i32_1 = arith.constant 0 : i32
    return %c0_i32, %c0_i32_0 : i32, i32
  }
  func.func @transform_9(%arg0: i32) -> (i32, i32) {
    %c0_i32 = arith.constant 0 : i32
    %c0_i32_0 = arith.constant 0 : i32
    return %arg0, %c0_i32 : i32, i32
  }
  func.func @transform_10(%arg0: i32) -> (i32, i32) {
    %c0_i32 = arith.constant 0 : i32
    %c0_i32_0 = arith.constant 0 : i32
    return %arg0, %c0_i32 : i32, i32
  }
}

</mosaic_0001>

<bundles_post_ra>
// kernel: tpu_custom_call.1
= control target key start
LH: loop header
LB: loop body
LE: loop exit
PB: predicated region body
PF: predicated region fallthrough
CT: control target
= control target key end

     0   :  { %17 = vsyncpa [#allocation4], 0  ;;  %s1116_s0 = inlined_call_operand.hbm [shape: f32[2,8,256], index: 0, kind: input, shape index: {}]   ;;  %s1117_s1 = inlined_call_operand.hbm [shape: f32[256,128], index: 1, kind: input, shape index: {}]   ;;  %s1118_s2 = inlined_call_operand.vmem [shape: f32[1,128], index: 2, kind: input, shape index: {}]   ;;  %s1119_s3 = inlined_call_operand.vmem [shape: f32[1,128], index: 3, kind: input, shape index: {}]   ;;  %s1120_s4 = inlined_call_operand.<no memory space> [shape: f32[1], index: 4, kind: input, shape index: {}]   ;;  %s1121_s5 = inlined_call_operand.hbm [shape: f32[256,128], index: 5, kind: input, shape index: {}]   ;;  %s1122_s6 = inlined_call_operand.vmem [shape: f32[1,128], index: 6, kind: input, shape index: {}]   ;;  %s1123_s7 = inlined_call_operand.vmem [shape: f32[2,128], index: 7, kind: input, shape index: {}]   ;;  %s1124_s8 = inlined_call_operand.vmem [shape: f32[1,2], index: 8, kind: input, shape index: {}]   ;;  %s1125_s9 = inlined_call_operand.hbm [shape: f32[2,8], index: 9, kind: output, shape index: {0}]   ;;  %s1126_s10 = inlined_call_operand.hbm [shape: f32[2,2], index: 10, kind: output, shape index: {1}]  }
   0x1   :  { %18 = vsyncpa [#allocation7], 0 }
   0x2   :  { %19 = vsyncpa [#allocation5], 0 }
   0x3   :  { %20 = vsyncpa [#allocation11], 0  ;;  %s933_s13 = smov [#allocation6]   ;;  %s815_s17 = scalar_lea.hbm %s1117_s1, 4096 }
   0x4   :  { %s38_s14 = sshll.u32 %s933_s13, 4  ;;  %p816_p0 = scmp.ne.s32.totalorder %s1117_s1, %s815_s17  ;;  %s39_s14 = int_to_ptr.vmem [resolvable:$true] %s38_s14 }
   0x5   :  { %p819_p1 = scmp.lt.u32.totalorder %s815_s17, %s1117_s1 }
   0x7   :  { %p821_p2 = pnand %p819_p1, %p816_p0 }
   0x9   :  { %824 = shalt.err (!%p821_p2)
}
   0xa   :  { %s825_s22 = scalar_lea.vmem %s39_s14, 4096  ;;  %p830_p4 = scmp.lt.s32.totalorder %s39_s14, %s39_s14 }
   0xb   :  { %p826_p3 = scmp.ne.s32.totalorder %s39_s14, %s825_s22  ;;  %p831_p5 = scmp.lt.s32.totalorder %s825_s22, %s825_s22 }
   0xd   :  { %p832_p6 = por %p831_p5, %p830_p4 }
   0xf   :  { %p833_p7 = pnand %p832_p6, %p826_p3 }
  0x11   :  { %836 = shalt.err (!%p833_p7)
}
  0x12   :  { %s934_s23 = smov 128   ;;  %s935_s24 = smov 8  }
  0x13   :  { %44 = dma.hbm_to_vmem [thread:$0]  %s1117_s1, 4096, %s39_s14, [#allocation7], %s934_s23, %s934_s23, %s935_s24  }
  0x14   :  { %s936_s27 = smov [#allocation3]   ;;  %s837_s11 = scalar_lea.hbm %s1116_s0, 512 }
  0x15   :  { %s26_s28 = sshll.u32 %s936_s27, 4  ;;  %p838_p8 = scmp.ne.s32.totalorder %s1116_s0, %s837_s11  ;;  %s27_s28 = int_to_ptr.vmem [resolvable:$true] %s26_s28 }
  0x16   :  { %p841_p9 = scmp.lt.u32.totalorder %s837_s11, %s1116_s0 }
  0x18   :  { %p843_p10 = pnand %p841_p9, %p838_p8 }
  0x1a   :  { %846 = shalt.err (!%p843_p10)
}
  0x1b   :  { %s847_s17 = scalar_lea.vmem %s27_s28, 512  ;;  %p852_p12 = scmp.lt.s32.totalorder %s27_s28, %s27_s28 }
  0x1c   :  { %p848_p11 = scmp.ne.s32.totalorder %s27_s28, %s847_s17  ;;  %p853_p13 = scmp.lt.s32.totalorder %s847_s17, %s847_s17 }
  0x1e   :  { %p854_p0 = por %p853_p13, %p852_p12 }
  0x20   :  { %p855_p1 = pnand %p854_p0, %p848_p11 }
  0x22   :  { %858 = shalt.err (!%p855_p1)
}
  0x23   :  { %s937_s1 = smov 256   ;;  %s938_s14 = smov 16  }
  0x24   :  { %32 = dma.hbm_to_vmem [thread:$0]  %s1116_s0, 512, %s27_s28, [#allocation4], %s937_s1, %s937_s1, %s938_s14  }
  0x25   :  { %s939_s20 = smov [#allocation8]   ;;  %s859_s26 = scalar_lea.hbm %s1121_s5, 4096 }
  0x26   :  { %s56_s21 = sshll.u32 %s939_s20, 4  ;;  %p860_p2 = scmp.ne.s32.totalorder %s1121_s5, %s859_s26  ;;  %s57_s21 = int_to_ptr.vmem [resolvable:$true] %s56_s21 }
  0x27   :  { %p863_p3 = scmp.lt.u32.totalorder %s859_s26, %s1121_s5 }
  0x29   :  { %p865_p4 = pnand %p863_p3, %p860_p2 }
  0x2b   :  { %868 = shalt.err (!%p865_p4)
}
  0x2c   :  { %s869_s12 = scalar_lea.vmem %s57_s21, 4096  ;;  %p874_p6 = scmp.lt.s32.totalorder %s57_s21, %s57_s21 }
  0x2d   :  { %p870_p5 = scmp.ne.s32.totalorder %s57_s21, %s869_s12  ;;  %p875_p7 = scmp.lt.s32.totalorder %s869_s12, %s869_s12 }
  0x2f   :  { %p876_p8 = por %p875_p7, %p874_p6 }
  0x31   :  { %p877_p9 = pnand %p876_p8, %p870_p5 }
  0x33   :  { %880 = shalt.err (!%p877_p9)
}
  0x34   :  { %62 = dma.hbm_to_vmem [thread:$0]  %s1121_s5, 4096, %s57_s21, [#allocation7], %s934_s23, %s934_s23, %s935_s24  }
  0x35   :  { %925 = dma.done.wait [#allocation4], 512  }
  0x36   :  { %926 = vsyncadd [#allocation4], 4294966784 }
  0x37   :  { %927 = dma.done.wait [#allocation7], 8192  }
  0x38   :  { %928 = vsyncadd [#allocation7], 4294959104  ;;  %v98_v0 = vld [vmem:[#allocation6 + $0x80] sm:$0xff]  ;;  %v99_v1 = vld [vmem:[#allocation6 + $0x88] sm:$0xff]  ;;  %vm241_vm2 = vcmask 1041409   ;;  %vm244_vm3 = vcmask 58368  }
  0x39   :  { %v82_v2 = vld [vmem:[#allocation6] sm:$0xff]  ;;  %v726_v3 = vpack.c.bf16 %v99_v1, %v98_v0  ;;  %v83_v4 = vld [vmem:[#allocation6 + $0x8] sm:$0xff]  ;;  %v100_v5 = vld [vmem:[#allocation6 + $0x90] sm:$0xff]  ;;  %vm320_vm4 = vcmask 64512   ;;  %vm593_vm5 = vcmask 1041408  }
  0x3a   :  { %v101_v6 = vld [vmem:[#allocation6 + $0x98] sm:$0xff]  ;;  %v728_v7 = vpack.c.bf16 %v83_v4, %v82_v2  ;;  %v84_v9 = vld [vmem:[#allocation6 + $0x10] sm:$0xff]  ;;  %v102_v11 = vld [vmem:[#allocation6 + $0xa0] sm:$0xff] }
  0x3b   :  { %v730_v8 = vpack.c.bf16 %v101_v6, %v100_v5  ;;  %v85_v10 = vld [vmem:[#allocation6 + $0x18] sm:$0xff]  ;;  %727 = vmatprep.subr.bf16.mxu0 %v726_v3  ;;  %v103_v12 = vld [vmem:[#allocation6 + $0xa8] sm:$0xff]  ;;  %v86_v15 = vld [vmem:[#allocation6 + $0x20] sm:$0xff] }
  0x3c   :  { %729 = vmatpush3.bf16.msra.mxu0 %v728_v7  ;;  %v732_v13 = vpack.c.bf16 %v85_v10, %v84_v9  ;;  %v734_v14 = vpack.c.bf16 %v103_v12, %v102_v11  ;;  %v87_v16 = vld [vmem:[#allocation6 + $0x28] sm:$0xff]  ;;  %v104_v17 = vld [vmem:[#allocation6 + $0xb0] sm:$0xff]  ;;  %v105_v18 = vld [vmem:[#allocation6 + $0xb8] sm:$0xff]  ;;  %v231_v9 = vlaneseq  ;;  %v212_v10 = vstv %s1120_s4 }
  0x3d   :  { %731 = vmatprep.subr.bf16.mxu0 %v730_v8  ;;  %v736_v19 = vpack.c.bf16 %v87_v16, %v86_v15  ;;  %v738_v20 = vpack.c.bf16 %v105_v18, %v104_v17  ;;  %v88_v21 = vld [vmem:[#allocation6 + $0x30] sm:$0xff]  ;;  %v89_v22 = vld [vmem:[#allocation6 + $0x38] sm:$0xff]  ;;  %v106_v23 = vld [vmem:[#allocation6 + $0xc0] sm:$0xff] }
  0x3e   :  { %v107_v24 = vld [vmem:[#allocation6 + $0xc8] sm:$0xff]  ;;  %v78_v26 = vld [vmem:[#allocation3] sm:$0xff]  ;;  %v740_v27 = vpack.c.bf16 %v89_v22, %v88_v21  ;;  %v81_v28 = vld [vmem:[#allocation3 + $0x18] sm:$0xff]  ;;  %v232_v12 = vand.u32 127, %v231_v9 }
  0x3f   :  { %v79_v25 = vld [vmem:[#allocation3 + $0x8] sm:$0xff]  ;;  %v742_v29 = vpack.c.bf16 %v107_v24, %v106_v23  ;;  %v90_v30 = vld [vmem:[#allocation6 + $0x40] sm:$0xff]  ;;  %v108_v32 = vld [vmem:[#allocation6 + $0xd0] sm:$0xff]  ;;  %v215_v52 = vand.u32 2147483647, %v78_v26 }
  0x40   :  { %733 = vmatpush3.bf16.msra.mxu0 %v732_v13  ;;  %185 = vmatprep.mubr.f32.mxu0 %v79_v25  ;;  %v91_v31 = vld [vmem:[#allocation6 + $0x48] sm:$0xff]  ;;  %v109_v33 = vld [vmem:[#allocation6 + $0xd8] sm:$0xff]  ;;  %v92_v36 = vld [vmem:[#allocation6 + $0x50] sm:$0xff]  ;;  %v216_v53 = vand.u32 2147483647, %v79_v25  ;;  %v234_v13 = vshrl.u32 %v231_v9, 7 }
  0x41   :  { %735 = vmatprep.subr.bf16.mxu0 %v734_v14  ;;  %323 = vmatprep.subr.mxu1 %v79_v25  ;;  %v744_v34 = vpack.c.bf16 %v91_v31, %v90_v30  ;;  %v746_v35 = vpack.c.bf16 %v109_v33, %v108_v32  ;;  %v93_v37 = vld [vmem:[#allocation6 + $0x58] sm:$0xff]  ;;  %v110_v38 = vld [vmem:[#allocation6 + $0xe0] sm:$0xff]  ;;  %v111_v39 = vld [vmem:[#allocation6 + $0xe8] sm:$0xff]  ;;  %v218_v56 = vand.u32 2147483647, %v81_v28  ;;  %v940_v25 = vmov 0  }
  0x42   :  { %324 = vmatpush1.msra.mxu1 %v78_v26  ;;  %v748_v40 = vpack.c.bf16 %v93_v37, %v92_v36  ;;  %v750_v41 = vpack.c.bf16 %v111_v39, %v110_v38  ;;  %v94_v42 = vld [vmem:[#allocation6 + $0x60] sm:$0xff]  ;;  %v95_v43 = vld [vmem:[#allocation6 + $0x68] sm:$0xff]  ;;  %v112_v44 = vld [vmem:[#allocation6 + $0xf0] sm:$0xff]  ;;  %v219_v54 = vmax.f32.f32 %v215_v52, %v216_v53  ;;  %v1054_v16 = vsub.s32 %v232_v12, %v234_v13 }
  0x43   :  { %396 = vmatprep.subr.mxu1 %v81_v28  ;;  %v113_v45 = vld [vmem:[#allocation6 + $0xf8] sm:$0xff]  ;;  %v752_v46 = vpack.c.bf16 %v95_v43, %v94_v42  ;;  %v96_v48 = vld [vmem:[#allocation6 + $0x70] sm:$0xff]  ;;  %v647_v59 = vld [vmem:[%s1118_s2] ss:$0 sm:$0xff]  ;;  %802 = vset.pattern.permute.xlu0 %v940_v25 }
  0x44   :  { %737 = vmatpush3.bf16.msra.mxu0 %v736_v19  ;;  %v754_v47 = vpack.c.bf16 %v113_v45, %v112_v44  ;;  %v97_v49 = vld [vmem:[#allocation6 + $0x78] sm:$0xff]  ;;  %v1041_v51 = vld [vmem:[#allocation3 + $0x10] sm:$0xff]  ;;  %220 = vmax.xlane.f32.xlu1 %v219_v54  ;;  %v648_v3 = vld [vmem:[%s1119_s3] ss:$0 sm:$0xff] }
  0x45   :  { %739 = vmatprep.subr.bf16.mxu0 %v738_v20  ;;  %v756_v50 = vpack.c.bf16 %v97_v49, %v96_v48  ;;  %v217_v55 = vand.u32 2147483647, %v1041_v51  ;;  %801 = vset.pattern.permute.xlu1 %v940_v25  ;;  %v941_v49 = vmov 0.0   ;;  %v483_v52 = vld [vmem:[#allocation8 + $0x80] sm:$0xff]  ;;  %v484_v53 = vld [vmem:[#allocation8 + $0x88] sm:$0xff]  ;;  %v489_v9 = vld [vmem:[#allocation8 + $0xb0] sm:$0xff] }
  0x46   :  { %387 = vmatprep.mubr.f32.mxu1 %v941_v49  ;;  %v477_v25 = vld [vmem:[#allocation8 + $0x50] sm:$0xff] }
  0x47   :  { %v222_v57 = vmax.f32.f32 %v217_v55, %v218_v56  ;;  %v758_v56 = vpack.c.bf16 %v484_v53, %v483_v52  ;;  %v651_v52 = vld [vmem:[%s1122_s6] ss:$0 sm:$0xff]  ;;  %s942_s6 = smov [#allocation9]  }
  0x48   :  { %741 = vmatpush3.bf16.msra.mxu0 %v740_v27  ;;  %v1062_v27 = vsub.s32 1, %v234_v13  ;;  %s623_s1 = sshll.u32 %s942_s6, 4  ;;  %s624_s1 = int_to_ptr.vmem [resolvable:$true] %s623_s1 }
  0x49   :  { %743 = vmatprep.subr.bf16.mxu0 %v742_v29  ;;  %223 = vmax.xlane.f32.xlu1 %v222_v57  ;;  %v467_v57 = vld [vmem:[#allocation8] sm:$0xff]  ;;  %s881_s14 = scalar_lea.vmem %s624_s1, 32  ;;  %p886_p11 = scmp.lt.s32.totalorder %s624_s1, %s624_s1 }
  0x4a   :  { %p882_p10 = scmp.ne.s32.totalorder %s624_s1, %s881_s14  ;;  %p887_p12 = scmp.lt.s32.totalorder %s881_s14, %s881_s14 }
  0x4c   :  { %745 = vmatpush3.bf16.msra.mxu0 %v744_v34  ;;  %p888_p13 = por %p887_p12, %p886_p11 }
  0x4d   :  { %747 = vmatprep.subr.bf16.mxu0 %v746_v35 }
  0x4e   :  { %p889_p0 = pnand %p888_p13, %p882_p10 }
  0x50   :  { %749 = vmatpush3.bf16.msra.mxu0 %v748_v40 }
  0x51   :  { %751 = vmatprep.subr.bf16.mxu0 %v750_v41 }
  0x54   :  { %753 = vmatpush3.bf16.msra.mxu0 %v752_v46 }
  0x55   :  { %755 = vmatprep.subr.bf16.mxu0 %v754_v47 }
  0x58   :  { %757 = vmatpush3.bf16.msra.mxu0 %v756_v50 }
  0x5b   :  { %186 = vmatmul.mubr.f32.vlgmr.msra.gmra.mrb[0].mxu0 %v78_v26  ;;  %v1060_v26 = vsub.s32 0, %v234_v13  ;;  %v473_v13 = vld [vmem:[#allocation8 + $0x30] sm:$0xff] }
  0x5c   :  { %190 = vmatprep.mubr.f32.mxu0 %v81_v28 }
  0x5f   :  { %191 = vmatmul.mubr.f32.gmra.mrb[2].mxu0 %v1041_v51 }
  0xd1   :  { %v221_v8 = vpop.xlane.xlu1 %220 }
  0xd2   :  { %vm225_vm0 = vcmp.eq.f32.partialorder %v221_v8, 0.0  ;;  %v472_v8 = vld [vmem:[#allocation8 + $0x28] sm:$0xff] }
  0xd6   :  { %v224_v15 = vpop.xlane.xlu1 %223 }
  0xd7   :  { %vm226_vm1 = vcmp.eq.f32.partialorder %v224_v15, 0.0  ;;  %v491_v15 = vld [vmem:[#allocation8 + $0xc0] sm:$0xff] }
 0x12e   :  { %v685_v58 = vpop.f32.mrb[0].mxu0 }
 0x12f   :  { %v686_v60 = vpop.f32.mrb[1].mxu0 }
 0x130   :  { %v687_v61 = vadd.f32 %v686_v60, %v685_v58  ;;  %v468_v58 = vld [vmem:[#allocation8 + $0x8] sm:$0xff]  ;;  %v486_v60 = vld [vmem:[#allocation8 + $0x98] sm:$0xff] }
 0x132   :  { %v188_v62 = vadd.f32 %v687_v61, %v647_v59  ;;  %v688_v63 = vpop.f32.mrb[2].mxu0 }
 0x133   :  { %v689_v0 = vpop.f32.mrb[3].mxu0 }
 0x134   :  { %803 = vtanh.f32 %v188_v62  ;;  %v690_v1 = vadd.f32 %v689_v0, %v688_v63  ;;  %v760_v62 = vpack.c.bf16 %v468_v58, %v467_v57 }
 0x136   :  { %v193_v2 = vadd.f32 %v690_v1, %v647_v59  ;;  %v485_v59 = vld [vmem:[#allocation8 + $0x90] sm:$0xff] }
 0x137   :  { %v762_v0 = vpack.c.bf16 %v486_v60, %v485_v59  ;;  %v469_v1 = vld [vmem:[#allocation8 + $0x10] sm:$0xff] }
 0x138   :  { %805 = vtanh.f32 %v193_v2  ;;  %v470_v2 = vld [vmem:[#allocation8 + $0x18] sm:$0xff] }
 0x13e   :  { %v804_v4 = vpop.eup %803 }
 0x13f   :  { %v205_v5 = vmul.f32 %v804_v4, %v648_v3  ;;  %v488_v4 = vld [vmem:[#allocation8 + $0xa8] sm:$0xff] }
 0x141   :  { %207 = vadd.xlane.f32.xlu0 %v205_v5 }
 0x142   :  { %v806_v6 = vpop.eup %805 }
 0x143   :  { %v206_v7 = vmul.f32 %v806_v6, %v648_v3  ;;  %v487_v3 = vld [vmem:[#allocation8 + $0xa0] sm:$0xff]  ;;  %v764_v6 = vpack.c.bf16 %v470_v2, %v469_v1 }
 0x145   :  { %209 = vadd.xlane.f32.xlu0 %v206_v7  ;;  %v471_v7 = vld [vmem:[#allocation8 + $0x20] sm:$0xff] }
 0x1ce   :  { %v208_v11 = vpop.xlane.xlu0 %207 }
 0x1cf   :  { %v213_v14 = vadd.f32 %v212_v10, %v208_v11  ;;  %v768_v11 = vpack.c.bf16 %v472_v8, %v471_v7 }
 0x1d1   :  { %v227_v18 = vsel %vm225_vm0, -9e+15, %v213_v14  ;;  %v474_v14 = vld [vmem:[#allocation8 + $0x38] sm:$0xff] }
 0x1d2   :  { %v210_v17 = vpop.xlane.xlu0 %209  ;;  %v236_v21 = vrot.slane %v227_v18, %v1054_v16 }
 0x1d3   :  { %v214_v19 = vadd.f32 %v212_v10, %v210_v17  ;;  %v490_v10 = vld [vmem:[#allocation8 + $0xb8] sm:$0xff]  ;;  %v772_v17 = vpack.c.bf16 %v474_v14, %v473_v13 }
 0x1d4   :  { %v770_v12 = vpack.c.bf16 %v490_v10, %v489_v9 }
 0x1d5   :  { %v228_v20 = vsel %vm226_vm1, -9e+15, %v214_v19  ;;  %v475_v19 = vld [vmem:[#allocation8 + $0x40] sm:$0xff] }
 0x1d6   :  { %v240_v22 = vrot.slane %v228_v20, %v1054_v16 }
 0x1d8   :  { %v242_v23 = vsel %vm241_vm2, %v240_v22, %v236_v21  ;;  %v493_v21 = vld [vmem:[#allocation8 + $0xd0] sm:$0xff]  ;;  %v494_v22 = vld [vmem:[#allocation8 + $0xd8] sm:$0xff] }
 0x1d9   :  { %v245_v24 = vsel %vm244_vm3, %v242_v23, -inf }
 0x1da   :  { %246 = vmax.xlane.f32.xlu0 %v245_v24  ;;  %v778_v24 = vpack.c.bf16 %v494_v22, %v493_v21 }
 0x267   :  { %v247_v28 = vpop.xlane.xlu0 %246 }
 0x268   :  { %v252_v29 = vrot.slane %v247_v28, %v1060_v26  ;;  %v256_v30 = vrot.slane %v247_v28, %v1062_v27  ;;  %v478_v28 = vld [vmem:[#allocation8 + $0x58] sm:$0xff] }
 0x26a   :  { %v259_v31 = vsub.f32 %v227_v18, %v252_v29  ;;  %v260_v32 = vsub.f32 %v228_v20, %v256_v30  ;;  %v476_v20 = vld [vmem:[#allocation8 + $0x48] sm:$0xff]  ;;  %v780_v29 = vpack.c.bf16 %v478_v28, %v477_v25  ;;  %v495_v30 = vld [vmem:[#allocation8 + $0xe0] sm:$0xff] }
 0x26b   :  { %v776_v23 = vpack.c.bf16 %v476_v20, %v475_v19 }
 0x26c   :  { %v261_v33 = vmul.f32 1.442695, %v259_v31  ;;  %v263_v34 = vmul.f32 1.442695, %v260_v32  ;;  %v496_v31 = vld [vmem:[#allocation8 + $0xe8] sm:$0xff] }
 0x26d   :  { %v782_v32 = vpack.c.bf16 %v496_v31, %v495_v30 }
 0x26e   :  { %807 = vpow2.f32 %v261_v33  ;;  %v479_v33 = vld [vmem:[#allocation8 + $0x60] sm:$0xff] }
 0x26f   :  { %809 = vpow2.f32 %v263_v34  ;;  %v480_v34 = vld [vmem:[#allocation8 + $0x68] sm:$0xff] }
 0x278   :  { %v808_v35 = vpop.eup %807 }
 0x279   :  { %v810_v36 = vpop.eup %809  ;;  %268 = vperm.xlu1 %801, %v808_v35  }
 0x27a   :  { %271 = vperm.xlu0 %802, %v810_v36  }
 0x2f8   :  { %v269_v37 = vpop.permute.xlu1 %268 }
 0x2f9   :  { %v272_v38 = vpop.permute.xlu0 %271  ;;  %v276_v39 = vrot.slane %v269_v37, %v1054_v16  ;;  %v498_v37 = vld [vmem:[#allocation8 + $0xf8] sm:$0xff] }
 0x2fa   :  { %v280_v40 = vrot.slane %v272_v38, %v1054_v16 }
 0x2fc   :  { %v281_v41 = vsel %vm241_vm2, %v280_v40, %v276_v39  ;;  %v481_v39 = vld [vmem:[#allocation8 + $0x70] sm:$0xff]  ;;  %v482_v40 = vld [vmem:[#allocation8 + $0x78] sm:$0xff] }
 0x2fd   :  { %v283_v42 = vsel %vm244_vm3, %v281_v41, 0.0  ;;  %v788_v41 = vpack.c.bf16 %v482_v40, %v481_v39 }
 0x2fe   :  { %284 = vadd.xlane.f32.xlu1 %v283_v42 }
 0x38b   :  { %v285_v43 = vpop.xlane.xlu1 %284 }
 0x38c   :  { %v290_v44 = vrot.slane %v285_v43, %v1060_v26  ;;  %v294_v45 = vrot.slane %v285_v43, %v1062_v27 }
 0x38e   :  { %811 = vrcp.f32 %v290_v44 }
 0x38f   :  { %813 = vrcp.f32 %v294_v45 }
 0x398   :  { %v812_v46 = vpop.eup %811 }
 0x399   :  { %v298_v47 = vmul.f32 %v812_v46, %v808_v35  ;;  %v814_v48 = vpop.eup %813  ;;  %v784_v35 = vpack.c.bf16 %v480_v34, %v479_v33 }
 0x39a   :  { %v300_v50 = vmul.f32 %v814_v48, %v810_v36  ;;  %v497_v36 = vld [vmem:[#allocation8 + $0xf0] sm:$0xff] }
 0x39b   :  { %304 = vperm.xlu0 %802, %v298_v47   ;;  %v786_v38 = vpack.c.bf16 %v498_v37, %v497_v36 }
 0x39f   :  { %307 = vperm.xlu0 %802, %v300_v50  }
 0x41a   :  { %v305_v54 = vpop.permute.xlu0 %304 }
 0x41b   :  { %v312_v55 = vrot.slane %v305_v54, %v1054_v16  ;;  %v587_v54 = vld [vmem:[%s1123_s7] sm:$0x3] }
 0x41c   :  { %v600_v57 = vrot.slane %v587_v54, %v1062_v27  ;;  %v591_v58 = vrot.slane %v587_v54, %v1060_v26 }
 0x41d   :  { %649 = vmatmul.mubr.msk.f32.vlgmr.msra.gmra.mrb[0].mxu1 %vm320_vm4, %v312_v55 }
 0x41e   :  { %397 = vmatpush1.msra.mxu1 %v1041_v51  ;;  %v308_v61 = vpop.permute.xlu0 %307  ;;  %460 = vmatprep.mubr.f32.mxu1 %v941_v49  ;;  %v766_v51 = vpack.c.bf16 %v488_v4, %v487_v3 }
 0x41f   :  { %v316_v63 = vrot.slane %v308_v61, %v1054_v16  ;;  %759 = vmatprep.subr.bf16.mxu1 %v758_v56  ;;  %v492_v16 = vld [vmem:[#allocation8 + $0xc8] sm:$0xff] }
 0x420   :  { %v774_v18 = vpack.c.bf16 %v492_v16, %v491_v15 }
 0x421   :  { %650 = vmatmul.mubr.msk.f32.vlgmr.msra.gmra.mrb[2].mxu1 %vm320_vm4, %v316_v63  ;;  %v317_v5 = vsel %vm241_vm2, %v316_v63, %v312_v55 }
 0x422   :  { %761 = vmatpush3.bf16.msra.mxu1 %v760_v62  ;;  %319 = vst.msk [vmem:[#allocation9] sm:$0x3] %vm244_vm3, %v317_v5 }
 0x423   :  { %763 = vmatprep.subr.bf16.mxu1 %v762_v0 }
 0x426   :  { %765 = vmatpush3.bf16.msra.mxu1 %v764_v6 }
 0x427   :  { %767 = vmatprep.subr.bf16.mxu1 %v766_v51 }
 0x42a   :  { %769 = vmatpush3.bf16.msra.mxu1 %v768_v11 }
 0x42b   :  { %771 = vmatprep.subr.bf16.mxu1 %v770_v12 }
 0x42e   :  { %773 = vmatpush3.bf16.msra.mxu1 %v772_v17 }
 0x42f   :  { %775 = vmatprep.subr.bf16.mxu1 %v774_v18 }
 0x432   :  { %777 = vmatpush3.bf16.msra.mxu1 %v776_v23 }
 0x433   :  { %779 = vmatprep.subr.bf16.mxu1 %v778_v24 }
 0x436   :  { %781 = vmatpush3.bf16.msra.mxu1 %v780_v29 }
 0x437   :  { %783 = vmatprep.subr.bf16.mxu1 %v782_v32 }
 0x43a   :  { %785 = vmatpush3.bf16.msra.mxu1 %v784_v35 }
 0x43b   :  { %787 = vmatprep.subr.bf16.mxu1 %v786_v38 }
 0x43e   :  { %789 = vmatpush3.bf16.msra.mxu1 %v788_v41 }
 0x4f0   :  { %v389_v42 = vpop.f32.mrb[0].mxu1 }
 0x4f1   :  { %v391_v43 = vpop.f32.mrb[1].mxu1 }
 0x4f4   :  { %v462_v44 = vpop.f32.mrb[2].mxu1 }
 0x4f5   :  { %v510_v45 = vrot.slane %v462_v44, 7  ;;  %v464_v46 = vpop.f32.mrb[3].mxu1 }
 0x4f6   :  { %v512_v47 = vrot.slane %v464_v46, 7 }
 0x4f7   :  { %v511_v48 = vsel %vm241_vm2, %v510_v45, %v389_v42 }
 0x4f8   :  { %v513_v49 = vsel %vm241_vm2, %v512_v47, %v391_v43 }
 0x4f9   :  { %580 = vmatprep.mubr.f32.mxu1 %v513_v49 }
 0x4fa   :  { %581 = vmatmul.mubr.f32.vlgmr.msra.gmra.mrb[4].mxu1 %v511_v48 }
 0x5cd   :  { %v723_v50 = vpop.f32.mrb[4].mxu1 }
 0x5ce   :  { %v724_v53 = vpop.f32.mrb[5].mxu1 }
 0x5cf   :  { %v725_v55 = vadd.f32 %v724_v53, %v723_v50 }
 0x5d1   :  { %v583_v56 = vadd.f32 %v725_v55, %v651_v52 }
 0x5d3   :  { %v586_v59 = vmax.f32 %v583_v56, 0.0 }
 0x5d5   :  { %v601_v60 = vmul.f32 %v600_v57, %v586_v59  ;;  %v592_v61 = vmul.f32 %v591_v58, %v586_v59 }
 0x5d7   :  { %v602_v62 = vsel %vm593_vm5, %v601_v60, 0.0  ;;  %v594_v63 = vsel %vm593_vm5, %v592_v61, 0.0 }
 0x5d8   :  { %603 = vadd.xlane.f32.xlu0 %v602_v62  ;;  %595 = vadd.xlane.f32.xlu1 %v594_v63 }
 0x5d9   :  { %892 = shalt.err (!%p889_p0)
}
 0x5da   :  { %s893_s19 = scalar_lea.hbm %s1125_s9, 32 }
 0x5db   :  { %p894_p1 = scmp.ne.s32.totalorder %s1125_s9, %s893_s19  ;;  %p897_p2 = scmp.lt.u32.totalorder %s893_s19, %s1125_s9 }
 0x5dd   :  { %p899_p3 = pnand %p897_p2, %p894_p1 }
 0x5df   :  { %902 = shalt.err (!%p899_p3)
}
 0x5e0   :  { %626 = dma.vmem_to_hbm [thread:$0]  %s624_s1, 32, %s1125_s9, [#allocation5]   ;;  %vm605_vm6 = vcmask 7168   ;;  %v652_v26 = vld [vmem:[%s1124_s8] ss:$0 sm:$0xff]  ;;  %vm615_vm7 = vcmask 9216  }
 0x5e1   :  { %s943_s11 = smov [#allocation10]  }
 0x5e2   :  { %s633_s12 = sshll.u32 %s943_s11, 4  ;;  %s634_s12 = int_to_ptr.vmem [resolvable:$true] %s633_s12 }
 0x5e3   :  { %s903_s0 = scalar_lea.vmem %s634_s12, 32  ;;  %p908_p5 = scmp.lt.s32.totalorder %s634_s12, %s634_s12 }
 0x5e4   :  { %p904_p4 = scmp.ne.s32.totalorder %s634_s12, %s903_s0  ;;  %p909_p6 = scmp.lt.s32.totalorder %s903_s0, %s903_s0 }
 0x5e6   :  { %p910_p7 = por %p909_p6, %p908_p5 }
 0x5e8   :  { %p911_p8 = pnand %p910_p7, %p904_p4 }
 0x665   :  { %v604_v27 = vpop.xlane.xlu0 %603  ;;  %v596_v0 = vpop.xlane.xlu1 %595 }
 0x666   :  { %v606_v1 = vsel %vm605_vm6, %v596_v0, %v604_v27 }
 0x667   :  { %v614_v2 = vadd.f32 %v652_v26, %v606_v1 }
 0x669   :  { %616 = vst.msk [vmem:[#allocation10] sm:$0x3] %vm615_vm7, %v614_v2 }
 0x66a   :  { %914 = shalt.err (!%p911_p8)
}
 0x66b   :  { %s915_s8 = scalar_lea.hbm %s1126_s10, 32 }
 0x66c   :  { %p916_p9 = scmp.ne.s32.totalorder %s1126_s10, %s915_s8  ;;  %p919_p10 = scmp.lt.u32.totalorder %s915_s8, %s1126_s10 }
 0x66e   :  { %p921_p11 = pnand %p919_p10, %p916_p9 }
 0x670   :  { %924 = shalt.err (!%p921_p11)
}
 0x671   :  { %636 = dma.vmem_to_hbm [thread:$0]  %s634_s12, 32, %s1126_s10, [#allocation11]  }
 0x672   :  { %929 = dma.done.wait [#allocation5], 32  }
 0x673   :  { %930 = vsyncadd [#allocation5], 4294967264 }
 0x674   :  { %931 = dma.done.wait [#allocation11], 32  }
 0x675   :  { %932 = vsyncadd [#allocation11], 4294967264 }
 0x676   :  { %643 = vsyncpa [#allocation4], 1 }
 0x677   :  { %644 = vsyncpa [#allocation7], 1 }
 0x678   :  { %645 = vsyncpa [#allocation5], 1 }
 0x679   :  { %646 = vsyncpa [#allocation11], 1 }

</bundles_post_ra>
